<compile_context>
chip_gen: v6e
topology: v6e:2x2x1
jax: 0.10.0
libtpu: 0.0.40
codegen_flags: <defaults>
</compile_context>

<pallas_src>
import functools

import jax
import jax.numpy as jnp
from jax.experimental import pallas as pl
from jax.experimental.pallas import tpu as pltpu


def _round_up(x, m):
    return ((x + m - 1) // m) * m


def _disc_kernel(x_ref, w1_ref, b1_ref, w2_ref, b2_ref, w3_ref, b3_ref, o_ref,
                 *, negative_slope: float, compute_dtype):
    x = x_ref[...]
    w1 = w1_ref[...]
    w2 = w2_ref[...]
    if compute_dtype is not None:
        # Cast matmul operands in-kernel (VMEM only) -- no extra HBM pass in the wrapper.
        x = x.astype(compute_dtype)
        w1 = w1.astype(compute_dtype)
        w2 = w2.astype(compute_dtype)

    # Layer 1: Linear + LeakyReLU(0.2).  f32 accumulation on the MXU.
    h1 = jnp.dot(x, w1, preferred_element_type=jnp.float32)
    h1 = h1 + b1_ref[...]
    h1 = jnp.where(h1 > 0, h1, negative_slope * h1)
    h1 = h1.astype(w2.dtype)  # back to compute dtype (no-op on the f32 path)

    # Layer 2: Linear + LeakyReLU(0.2).  f32 accumulation; bias/activation in f32.
    h2 = jnp.dot(h1, w2, preferred_element_type=jnp.float32)
    h2 = h2 + b2_ref[...]
    h2 = jnp.where(h2 > 0, h2, negative_slope * h2)

    # Layer 3: out_features == 1.  Broadcast multiply by the (1, h) weight row and
    # reduce over the lane axis (XLU) -- no padded 128-column matmul, and the store
    # is a narrow (block_b, 1) block instead of a 128x-padded writeback.
    w3_row = w3_ref[...].astype(jnp.float32)          # (1, h)
    out = jnp.sum(h2 * w3_row, axis=-1, keepdims=True) + b3_ref[...]
    o_ref[...] = out.astype(o_ref.dtype)


def discriminator_forward(x, params, *, block_b=None, negative_slope=0.2,
                          compute_dtype=None):
    """x: (B, D_in).  params: dict of w1,b1,w2,b2,w3,b3 (W as (in, out)).

    compute_dtype: None (use the stored dtypes as-is) or jnp.bfloat16 to run the
    matmuls at bf16 MXU rate on any generation (v5e/v6e/v7x); accumulation, bias
    adds and LeakyReLU stay f32.  Output dtype follows x.dtype.
    """
    w1, b1, w2, b2, w3, b3 = (params["w1"], params["b1"], params["w2"],
                              params["b2"], params["w3"], params["b3"])
    B, d_in = x.shape
    h3 = w1.shape[1]
    h = w2.shape[1]

    # --- batch tiling: big tiles, but keep >= 2 grid steps when possible so the
    # "parallel" batch axis can shard across both TensorCores on v7x. -----------------
    if block_b is None:
        block_b = max(8, min(1024, _round_up(pl.cdiv(B, 2), 8)))
    block_b = _round_up(block_b, 8)
    grid_b = pl.cdiv(B, block_b)

    # Tiny per-call reshapes of the small params only (no pass over x).
    b1_2d = b1.reshape(1, h3)
    b2_2d = b2.reshape(1, h)
    w3_row = w3.reshape(1, h)     # (h, 1) -> (1, h)
    b3_2d = b3.reshape(1, 1)

    # Rough VMEM estimate (x tile double-buffered + weights + biases + out tile).
    x_item = jnp.dtype(x.dtype).itemsize
    w_item = jnp.dtype(w1.dtype).itemsize
    vmem_est = (2 * block_b * d_in * x_item
                + 2 * (d_in * h3 + h3 * h + h) * w_item
                + 2 * (h3 + h + 1) * 4
                + 2 * block_b * x_item)
    cp_kwargs = dict(dimension_semantics=("parallel",))
    if vmem_est > 14 * 1024 * 1024:
        # Needed for very large tiles on v5e (16 MiB scoped default); capped below
        # v7x's 64 MiB physical VMEM.
        cp_kwargs["vmem_limit_bytes"] = min(int(vmem_est * 1.5) + (1 << 20),
                                            64 * 1024 * 1024)

    kernel = functools.partial(_disc_kernel, negative_slope=negative_slope,
                               compute_dtype=compute_dtype)

    out = pl.pallas_call(
        kernel,
        out_shape=jax.ShapeDtypeStruct((B, 1), x.dtype),
        grid=(grid_b,),
        in_specs=[
            pl.BlockSpec((block_b, d_in), lambda i: (i, 0)),   # x tile (streams over batch)
            pl.BlockSpec((d_in, h3), lambda i: (0, 0)),        # W1 (resident)
            pl.BlockSpec((1, h3), lambda i: (0, 0)),           # b1
            pl.BlockSpec((h3, h), lambda i: (0, 0)),           # W2 (resident)
            pl.BlockSpec((1, h), lambda i: (0, 0)),            # b2
            pl.BlockSpec((1, h), lambda i: (0, 0)),            # W3 as a (1, h) row
            pl.BlockSpec((1, 1), lambda i: (0, 0)),            # b3
        ],
        out_specs=pl.BlockSpec((block_b, 1), lambda i: (i, 0)),
        compiler_params=pltpu.CompilerParams(**cp_kwargs),
    )(x, w1, b1_2d, w2, b2_2d, w3_row, b3_2d)

    return out  # (B, 1); ragged last block's OOB rows were masked on store.


def init_params(key, expanded_image_dim=784, hidden_layer_dim=128,
                dtype=jnp.float32):
    """Deterministic synthetic init (PyTorch-like uniform bounds).

    Pass dtype=jnp.bfloat16 to store weights in bf16 once at init (true HBM saving)
    instead of casting per forward call.
    """
    # TODO(synk): for non-default hidden dims not divisible by 128 (e.g. 192/64), a
    # one-time zero-pad of W2/W3 lane dims to multiples of 128 at init would make the
    # layer-2/3 tiles fully lane-dense (minor win; default 384/128 is already aligned).
    h3 = hidden_layer_dim * 3
    k1, k2, k3, k4, k5, k6 = jax.random.split(key, 6)

    def lin(kw, kb, fan_in, fan_out):
        bound = 1.0 / jnp.sqrt(fan_in)
        w = jax.random.uniform(kw, (fan_in, fan_out), jnp.float32, -bound, bound)
        b = jax.random.uniform(kb, (fan_out,), jnp.float32, -bound, bound)
        return w.astype(dtype), b.astype(dtype)

    w1, b1 = lin(k1, k2, expanded_image_dim, h3)
    w2, b2 = lin(k3, k4, h3, hidden_layer_dim)
    w3, b3 = lin(k5, k6, hidden_layer_dim, 1)
    return {"w1": w1, "b1": b1, "w2": w2, "b2": b2, "w3": w3, "b3": b3}


def reference_forward(x, p, negative_slope=0.2):
    h = x @ p["w1"] + p["b1"]
    h = jnp.where(h > 0, h, negative_slope * h)
    h = h @ p["w2"] + p["b2"]
    h = jnp.where(h > 0, h, negative_slope * h)
    return h @ p["w3"] + p["b3"]


def reference_forward_bf16(x, p, negative_slope=0.2):
    """Mimics the kernel's bf16 compute path (bf16 matmul operands, f32 accumulation)."""
    bf = jnp.bfloat16
    h = jnp.dot(x.astype(bf), p["w1"].astype(bf), preferred_element_type=jnp.float32)
    h = h + p["b1"]
    h = jnp.where(h > 0, h, negative_slope * h).astype(bf)
    h = jnp.dot(h, p["w2"].astype(bf), preferred_element_type=jnp.float32)
    h = h + p["b2"]
    h = jnp.where(h > 0, h, negative_slope * h)
    return h @ p["w3"] + p["b3"]


if __name__ == "__main__":
    # Small shapes consistent with the module: flattened image dim 256,
    # hidden_layer_dim 64 (-> 192 / 64 / 1), batch 16.
    expanded_image_dim = 256
    hidden_layer_dim = 64
    batch = 16

    key = jax.random.PRNGKey(0)
    kx, kp = jax.random.split(key)
    x = jax.random.normal(kx, (batch, expanded_image_dim), jnp.float32)
    params = init_params(kp, expanded_image_dim, hidden_layer_dim)

    # f32 path (default; two 8-row grid steps so both TCs can be used on v7x).
    out = discriminator_forward(x, params)
    out = jax.block_until_ready(out)
    ref = reference_forward(x, params)
    assert out.shape == (batch, 1)
    assert jnp.allclose(out, ref, atol=1e-4, rtol=1e-4), "mismatch vs JAX reference (f32)"

    # bf16 compute path (x / weights cast in-kernel; f32 accumulation and epilogue).
    out_bf16 = discriminator_forward(x, params, compute_dtype=jnp.bfloat16)
    out_bf16 = jax.block_until_ready(out_bf16)
    ref_bf16 = reference_forward_bf16(x, params)
    assert out_bf16.shape == (batch, 1)
    assert jnp.allclose(out_bf16, ref_bf16, atol=5e-2, rtol=5e-2), \
        "mismatch vs reference (bf16)"

    print("KERNEL_OK")
</pallas_src>

<mosaic_0001>
module attributes {stable_mosaic.version = 11 : i64} {
  func.func @_disc_kernel(%arg0: i32, %arg1: memref<8x256xf32, #tpu.memory_space<vmem>>, %arg2: memref<256x192xf32, #tpu.memory_space<vmem>>, %arg3: memref<1x192xf32, #tpu.memory_space<vmem>>, %arg4: memref<192x64xf32, #tpu.memory_space<vmem>>, %arg5: memref<1x64xf32, #tpu.memory_space<vmem>>, %arg6: memref<1x64xf32, #tpu.memory_space<vmem>>, %arg7: memref<1x1xf32, #tpu.memory_space<vmem>>, %arg8: memref<8x1xf32, #tpu.memory_space<vmem>>) attributes {dimension_semantics = [#tpu.dimension_semantics<parallel>], iteration_bounds = array<i64: 2>, scalar_prefetch = 0 : i64, scratch_operands = 0 : i64, tpu.core_type = #tpu.core_type<tc>, window_params = [{transform_indices = @transform_0, window_bounds = array<i64: 8, 256>}, {pipeline_mode = #tpu.pipeline_mode<synchronous>, transform_indices = @transform_1, window_bounds = array<i64: 256, 192>}, {pipeline_mode = #tpu.pipeline_mode<synchronous>, transform_indices = @transform_2, window_bounds = array<i64: 1, 192>}, {pipeline_mode = #tpu.pipeline_mode<synchronous>, transform_indices = @transform_3, window_bounds = array<i64: 192, 64>}, {pipeline_mode = #tpu.pipeline_mode<synchronous>, transform_indices = @transform_4, window_bounds = array<i64: 1, 64>}, {pipeline_mode = #tpu.pipeline_mode<synchronous>, transform_indices = @transform_5, window_bounds = array<i64: 1, 64>}, {pipeline_mode = #tpu.pipeline_mode<synchronous>, transform_indices = @transform_6, window_bounds = array<i64: 1, 1>}, {transform_indices = @transform_7, window_bounds = array<i64: 8, 1>}]} {
    %c0 = arith.constant 0 : index
    %c0_0 = arith.constant 0 : index
    %0 = vector.load %arg1[%c0, %c0_0] : memref<8x256xf32, #tpu.memory_space<vmem>>, vector<8x256xf32>
    %c0_1 = arith.constant 0 : index
    %c0_2 = arith.constant 0 : index
    %1 = vector.load %arg2[%c0_1, %c0_2] : memref<256x192xf32, #tpu.memory_space<vmem>>, vector<256x192xf32>
    %c0_3 = arith.constant 0 : index
    %c0_4 = arith.constant 0 : index
    %2 = vector.load %arg4[%c0_3, %c0_4] : memref<192x64xf32, #tpu.memory_space<vmem>>, vector<192x64xf32>
    %cst = arith.constant dense<0.000000e+00> : vector<8x192xf32>
    %3 = tpu.matmul %0, %1, %cst {dimension_numbers = #tpu.dot_dimension_numbers<[1], [0], [0], [1], [0, 0, 1, 1], [], []>} : vector<8x256xf32>, vector<256x192xf32>, vector<8x192xf32> -> vector<8x192xf32>
    %c0_5 = arith.constant 0 : index
    %c0_6 = arith.constant 0 : index
    %4 = vector.load %arg3[%c0_5, %c0_6] : memref<1x192xf32, #tpu.memory_space<vmem>>, vector<1x192xf32>
    %5 = vector.broadcast %4 : vector<1x192xf32> to vector<8x192xf32>
    %6 = arith.addf %3, %5 : vector<8x192xf32>
    %cst_7 = arith.constant 0.000000e+00 : f32
    %7 = vector.broadcast %cst_7 : f32 to vector<8x192xf32>
    %8 = arith.cmpf ogt, %6, %7 : vector<8x192xf32>
    %cst_8 = arith.constant 2.000000e-01 : f32
    %9 = vector.broadcast %cst_8 : f32 to vector<8x192xf32>
    %10 = arith.mulf %9, %6 : vector<8x192xf32>
    %11 = arith.select %8, %6, %10 : vector<8x192xi1>, vector<8x192xf32>
    %cst_9 = arith.constant dense<0.000000e+00> : vector<8x64xf32>
    %12 = tpu.matmul %11, %2, %cst_9 {dimension_numbers = #tpu.dot_dimension_numbers<[1], [0], [0], [1], [0, 0, 1, 1], [], []>} : vector<8x192xf32>, vector<192x64xf32>, vector<8x64xf32> -> vector<8x64xf32>
    %c0_10 = arith.constant 0 : index
    %c0_11 = arith.constant 0 : index
    %13 = vector.load %arg5[%c0_10, %c0_11] : memref<1x64xf32, #tpu.memory_space<vmem>>, vector<1x64xf32>
    %14 = vector.broadcast %13 : vector<1x64xf32> to vector<8x64xf32>
    %15 = arith.addf %12, %14 : vector<8x64xf32>
    %cst_12 = arith.constant 0.000000e+00 : f32
    %16 = vector.broadcast %cst_12 : f32 to vector<8x64xf32>
    %17 = arith.cmpf ogt, %15, %16 : vector<8x64xf32>
    %cst_13 = arith.constant 2.000000e-01 : f32
    %18 = vector.broadcast %cst_13 : f32 to vector<8x64xf32>
    %19 = arith.mulf %18, %15 : vector<8x64xf32>
    %20 = arith.select %17, %15, %19 : vector<8x64xi1>, vector<8x64xf32>
    %c0_14 = arith.constant 0 : index
    %c0_15 = arith.constant 0 : index
    %21 = vector.load %arg6[%c0_14, %c0_15] : memref<1x64xf32, #tpu.memory_space<vmem>>, vector<1x64xf32>
    %22 = vector.broadcast %21 : vector<1x64xf32> to vector<8x64xf32>
    %23 = arith.mulf %20, %22 : vector<8x64xf32>
    %cst_16 = arith.constant dense<0.000000e+00> : vector<8xf32>
    %24 = vector.multi_reduction <add>, %23, %cst_16 [1] : vector<8x64xf32> to vector<8xf32>
    %25 = vector.shape_cast %24 : vector<8xf32> to vector<8x1xf32>
    %c0_17 = arith.constant 0 : index
    %c0_18 = arith.constant 0 : index
    %26 = vector.load %arg7[%c0_17, %c0_18] : memref<1x1xf32, #tpu.memory_space<vmem>>, vector<1x1xf32>
    %27 = vector.broadcast %26 : vector<1x1xf32> to vector<8x1xf32>
    %28 = arith.addf %25, %27 : vector<8x1xf32>
    %c0_19 = arith.constant 0 : index
    %c0_20 = arith.constant 0 : index
    %29 = vector.load %arg8[%c0_19, %c0_20] : memref<8x1xf32, #tpu.memory_space<vmem>>, vector<8x1xf32>
    tpu.vector_store %arg8[%c0_19, %c0_20], %28 {strides = array<i32>} : memref<8x1xf32, #tpu.memory_space<vmem>>, vector<8x1xf32>,
    return
  }
  func.func @transform_0(%arg0: i32) -> (i32, i32) {
    %c0_i32 = arith.constant 0 : i32
    %c0_i32_0 = arith.constant 0 : i32
    return %arg0, %c0_i32 : i32, i32
  }
  func.func @transform_1(%arg0: i32) -> (i32, i32) {
    %c0_i32 = arith.constant 0 : i32
    %c0_i32_0 = arith.constant 0 : i32
    %c0_i32_1 = arith.constant 0 : i32
    return %c0_i32, %c0_i32_0 : i32, i32
  }
  func.func @transform_2(%arg0: i32) -> (i32, i32) {
    %c0_i32 = arith.constant 0 : i32
    %c0_i32_0 = arith.constant 0 : i32
    %c0_i32_1 = arith.constant 0 : i32
    return %c0_i32, %c0_i32_0 : i32, i32
  }
  func.func @transform_3(%arg0: i32) -> (i32, i32) {
    %c0_i32 = arith.constant 0 : i32
    %c0_i32_0 = arith.constant 0 : i32
    %c0_i32_1 = arith.constant 0 : i32
    return %c0_i32, %c0_i32_0 : i32, i32
  }
  func.func @transform_4(%arg0: i32) -> (i32, i32) {
    %c0_i32 = arith.constant 0 : i32
    %c0_i32_0 = arith.constant 0 : i32
    %c0_i32_1 = arith.constant 0 : i32
    return %c0_i32, %c0_i32_0 : i32, i32
  }
  func.func @transform_5(%arg0: i32) -> (i32, i32) {
    %c0_i32 = arith.constant 0 : i32
    %c0_i32_0 = arith.constant 0 : i32
    %c0_i32_1 = arith.constant 0 : i32
    return %c0_i32, %c0_i32_0 : i32, i32
  }
  func.func @transform_6(%arg0: i32) -> (i32, i32) {
    %c0_i32 = arith.constant 0 : i32
    %c0_i32_0 = arith.constant 0 : i32
    %c0_i32_1 = arith.constant 0 : i32
    return %c0_i32, %c0_i32_0 : i32, i32
  }
  func.func @transform_7(%arg0: i32) -> (i32, i32) {
    %c0_i32 = arith.constant 0 : i32
    %c0_i32_0 = arith.constant 0 : i32
    return %arg0, %c0_i32 : i32, i32
  }
}

</mosaic_0001>

<bundles_post_ra>
// kernel: tpu_custom_call.1
= control target key start
LH: loop header
LB: loop body
LE: loop exit
PB: predicated region body
PF: predicated region fallthrough
CT: control target
= control target key end

     0   :  { %s692_s26 = smov 0   ;;  %s1018_s0 = inlined_call_operand.vmem [shape: f32[16,256], index: 0, kind: input, shape index: {}]   ;;  %s1019_s1 = inlined_call_operand.vmem [shape: f32[256,192], index: 1, kind: input, shape index: {}]   ;;  %s1020_s2 = inlined_call_operand.vmem [shape: f32[1,192], index: 2, kind: input, shape index: {}]   ;;  %s1021_s3 = inlined_call_operand.vmem [shape: f32[192,64], index: 3, kind: input, shape index: {}]   ;;  %s1022_s4 = inlined_call_operand.vmem [shape: f32[1,64], index: 4, kind: input, shape index: {}]   ;;  %s1023_s5 = inlined_call_operand.vmem [shape: f32[1,64], index: 5, kind: input, shape index: {}]   ;;  %s1024_s6 = inlined_call_operand.<no memory space> [shape: f32[1,1], index: 6, kind: input, shape index: {}]   ;;  %s1025_s7 = inlined_call_operand.vmem [shape: f32[16,1], index: 7, kind: output, shape index: {}]  }
   0x1   :  { %v12_v0 = vstv %s1024_s6 }
   0x2   :  { %13 = vst [vmem:[#allocation2] sm:$0x1] %v12_v0 }
   0x3 LB: > { %s616_s27 = sadd.s32 4294967295, %s646_s26   ;;  %p620_p0 = scmp.ge.s32.totalorder %s646_s26, 1  ;;  %s646_s26 = sphi %s692_s26, %s19_s26  }
   0x4   : > { %p239_p1 = scmp.lt.s32.totalorder %s646_s26, 3 }
   0x6   : > { %p240_p2 = pnand %p620_p0, %p239_p1 }
   0x7   : > { %p270_p3 = scmp.lt.s32.totalorder (!%p240_p2), %s616_s27, 1 }
   0x8   : > { %243 = sbr.rel (%p240_p2) target bundleno = 621 (0x26d), region = 48 }
   0xd   : > { %v312_v1 = vld [vmem:[%s1019_s1 + $0xf8] sm:$0xff]  ;;  %v311_v2 = vld [vmem:[%s1019_s1 + $0xf0] sm:$0xff]  ;;  %v310_v3 = vld [vmem:[%s1019_s1 + $0xe8] sm:$0xff]  ;;  %v648_v5 = vmov 0.0   ;;  %s1027_s27 = smov (!%p270_p3, %s616_s27), 1  ;;  %vm465_vm1 = vcmask 523264  }
   0xe   : > { %381 = vmatprep.subr.mxu0 %v312_v1  ;;  %v309_v4 = vld [vmem:[%s1019_s1 + $0xe0] sm:$0xff]  ;;  %469 = vmatprep.subr.mxu1 %v648_v5  ;;  %v308_v6 = vld [vmem:[%s1019_s1 + $0xd8] sm:$0xff]  ;;  %v307_v7 = vld [vmem:[%s1019_s1 + $0xd0] sm:$0xff]  ;;  %s630_s18 = sshll.u32 %s1027_s27, 4  ;;  %s623_s19 = sshll.u32 %s1027_s27, 3  ;;  %vm561_vm4 = vcmask 7168  }
   0xf   : > { %382 = vmatpush1.msra.mxu0 %v311_v2  ;;  %v306_v8 = vld [vmem:[%s1019_s1 + $0xc8] sm:$0xff]  ;;  %v305_v9 = vld [vmem:[%s1019_s1 + $0xc0] sm:$0xff]  ;;  %v304_v10 = vld [vmem:[%s1019_s1 + $0xb8] sm:$0xff]  ;;  %s774_s29 = scalar_lea.vmem %s1018_s0, %s630_s18  ;;  %s278_s22 = scalar_lea.vmem %s1025_s7, %s623_s19 }
  0x10   : > { %383 = vmatprep.subr.mxu0 %v310_v3  ;;  %v303_v11 = vld [vmem:[%s1019_s1 + $0xb0] sm:$0xff]  ;;  %v302_v12 = vld [vmem:[%s1019_s1 + $0xa8] sm:$0xff]  ;;  %v301_v13 = vld [vmem:[%s1019_s1 + $0xa0] sm:$0xff] }
  0x11   : > { %384 = vmatpush1.msra.mxu0 %v309_v4  ;;  %v300_v14 = vld [vmem:[%s1019_s1 + $0x98] sm:$0xff]  ;;  %v299_v15 = vld [vmem:[%s1019_s1 + $0x90] sm:$0xff]  ;;  %v298_v16 = vld [vmem:[%s1019_s1 + $0x88] sm:$0xff] }
  0x12   : > { %385 = vmatprep.subr.mxu0 %v308_v6  ;;  %v297_v17 = vld [vmem:[%s1019_s1 + $0x80] sm:$0xff]  ;;  %v296_v18 = vld [vmem:[%s1019_s1 + $0x78] sm:$0xff]  ;;  %v295_v19 = vld [vmem:[%s1019_s1 + $0x70] sm:$0xff] }
  0x13   : > { %386 = vmatpush1.msra.mxu0 %v307_v7  ;;  %v294_v20 = vld [vmem:[%s1019_s1 + $0x68] sm:$0xff]  ;;  %v293_v21 = vld [vmem:[%s1019_s1 + $0x60] sm:$0xff]  ;;  %v292_v22 = vld [vmem:[%s1019_s1 + $0x58] sm:$0xff] }
  0x14   : > { %387 = vmatprep.subr.mxu0 %v306_v8  ;;  %v291_v23 = vld [vmem:[%s1019_s1 + $0x50] sm:$0xff]  ;;  %v290_v24 = vld [vmem:[%s1019_s1 + $0x48] sm:$0xff]  ;;  %v289_v25 = vld [vmem:[%s1019_s1 + $0x40] sm:$0xff] }
  0x15   : > { %388 = vmatpush1.msra.mxu0 %v305_v9  ;;  %v280_v26 = vld [vmem:[%s774_s29 + $0x8] sm:$0xff]  ;;  %v288_v27 = vld [vmem:[%s1019_s1 + $0x38] sm:$0xff]  ;;  %v359_v29 = vld [vmem:[%s1021_s3 + $0x70] sm:$0xff] }
  0x16   : > { %389 = vmatprep.subr.mxu0 %v304_v10  ;;  %445 = vmatprep.mubr.f32.mxu0 %v280_v26  ;;  %v360_v28 = vld [vmem:[%s1021_s3 + $0x78] sm:$0xff]  ;;  %v287_v30 = vld [vmem:[%s1019_s1 + $0x30] sm:$0xff]  ;;  %v286_v31 = vld [vmem:[%s1019_s1 + $0x28] sm:$0xff] }
  0x17   : > { %390 = vmatpush1.msra.mxu0 %v303_v11  ;;  %470 = vmatpush1.msra.mxu1 %v360_v28  ;;  %v358_v32 = vld [vmem:[%s1021_s3 + $0x68] sm:$0xff]  ;;  %v285_v33 = vld [vmem:[%s1019_s1 + $0x20] sm:$0xff]  ;;  %v284_v34 = vld [vmem:[%s1019_s1 + $0x18] sm:$0xff] }
  0x18   : > { %391 = vmatprep.subr.mxu0 %v302_v12  ;;  %471 = vmatprep.subr.mxu1 %v648_v5  ;;  %v357_v35 = vld [vmem:[%s1021_s3 + $0x60] sm:$0xff]  ;;  %v283_v36 = vld [vmem:[%s1019_s1 + $0x10] sm:$0xff]  ;;  %v282_v37 = vld [vmem:[%s1019_s1 + $0x8] sm:$0xff] }
  0x19   : > { %392 = vmatpush1.msra.mxu0 %v301_v13  ;;  %472 = vmatpush1.msra.mxu1 %v359_v29  ;;  %v356_v38 = vld [vmem:[%s1021_s3 + $0x58] sm:$0xff]  ;;  %v281_v39 = vld [vmem:[%s1019_s1] sm:$0xff]  ;;  %v355_v41 = vld [vmem:[%s1021_s3 + $0x50] sm:$0xff]  ;;  %v371_v29 = vlaneseq }
  0x1a   : > { %393 = vmatprep.subr.mxu0 %v300_v14  ;;  %473 = vmatprep.subr.mxu1 %v648_v5  ;;  %v344_v40 = vld [vmem:[%s1019_s1 + $0x1f8] sm:$0xff]  ;;  %v343_v42 = vld [vmem:[%s1019_s1 + $0x1f0] sm:$0xff]  ;;  %v342_v43 = vld [vmem:[%s1019_s1 + $0x1e8] sm:$0xff] }
  0x1b   : > { %394 = vmatpush1.msra.mxu0 %v299_v15  ;;  %474 = vmatpush1.msra.mxu1 %v358_v32  ;;  %v354_v44 = vld [vmem:[%s1021_s3 + $0x48] sm:$0xff]  ;;  %v341_v45 = vld [vmem:[%s1019_s1 + $0x1e0] sm:$0xff]  ;;  %v340_v46 = vld [vmem:[%s1019_s1 + $0x1d8] sm:$0xff] }
  0x1c   : > { %395 = vmatprep.subr.mxu0 %v298_v16  ;;  %475 = vmatprep.subr.mxu1 %v648_v5  ;;  %v353_v47 = vld [vmem:[%s1021_s3 + $0x40] sm:$0xff]  ;;  %v339_v48 = vld [vmem:[%s1019_s1 + $0x1d0] sm:$0xff]  ;;  %v338_v49 = vld [vmem:[%s1019_s1 + $0x1c8] sm:$0xff] }
  0x1d   : > { %396 = vmatpush1.msra.mxu0 %v297_v17  ;;  %476 = vmatpush1.msra.mxu1 %v357_v35  ;;  %v352_v50 = vld [vmem:[%s1021_s3 + $0x38] sm:$0xff]  ;;  %v337_v51 = vld [vmem:[%s1019_s1 + $0x1c0] sm:$0xff]  ;;  %v351_v53 = vld [vmem:[%s1021_s3 + $0x30] sm:$0xff] }
  0x1e   : > { %397 = vmatprep.subr.mxu0 %v296_v18  ;;  %477 = vmatprep.subr.mxu1 %v648_v5  ;;  %v336_v52 = vld [vmem:[%s1019_s1 + $0x1b8] sm:$0xff]  ;;  %v335_v54 = vld [vmem:[%s1019_s1 + $0x1b0] sm:$0xff]  ;;  %v334_v55 = vld [vmem:[%s1019_s1 + $0x1a8] sm:$0xff] }
  0x1f   : > { %398 = vmatpush1.msra.mxu0 %v295_v19  ;;  %478 = vmatpush1.msra.mxu1 %v356_v38  ;;  %v350_v56 = vld [vmem:[%s1021_s3 + $0x28] sm:$0xff]  ;;  %v333_v57 = vld [vmem:[%s1019_s1 + $0x1a0] sm:$0xff]  ;;  %v332_v58 = vld [vmem:[%s1019_s1 + $0x198] sm:$0xff] }
  0x20   : > { %399 = vmatprep.subr.mxu0 %v294_v20  ;;  %479 = vmatprep.subr.mxu1 %v648_v5  ;;  %v349_v59 = vld [vmem:[%s1021_s3 + $0x20] sm:$0xff]  ;;  %v331_v60 = vld [vmem:[%s1019_s1 + $0x190] sm:$0xff]  ;;  %v330_v61 = vld [vmem:[%s1019_s1 + $0x188] sm:$0xff] }
  0x21   : > { %400 = vmatpush1.msra.mxu0 %v293_v21  ;;  %480 = vmatpush1.msra.mxu1 %v355_v41  ;;  %v348_v62 = vld [vmem:[%s1021_s3 + $0x18] sm:$0xff]  ;;  %v329_v63 = vld [vmem:[%s1019_s1 + $0x180] sm:$0xff]  ;;  %v347_v1 = vld [vmem:[%s1021_s3 + $0x10] sm:$0xff] }
  0x22   : > { %401 = vmatprep.subr.mxu0 %v292_v22  ;;  %481 = vmatprep.subr.mxu1 %v648_v5  ;;  %v328_v0 = vld [vmem:[%s1019_s1 + $0x178] sm:$0xff]  ;;  %v327_v2 = vld [vmem:[%s1019_s1 + $0x170] sm:$0xff]  ;;  %v326_v3 = vld [vmem:[%s1019_s1 + $0x168] sm:$0xff] }
  0x23   : > { %402 = vmatpush1.msra.mxu0 %v291_v23  ;;  %482 = vmatpush1.msra.mxu1 %v354_v44  ;;  %v346_v4 = vld [vmem:[%s1021_s3 + $0x8] sm:$0xff]  ;;  %v325_v6 = vld [vmem:[%s1019_s1 + $0x160] sm:$0xff]  ;;  %v324_v7 = vld [vmem:[%s1019_s1 + $0x158] sm:$0xff] }
  0x24   : > { %403 = vmatprep.subr.mxu0 %v290_v24  ;;  %483 = vmatprep.subr.mxu1 %v648_v5  ;;  %v345_v8 = vld [vmem:[%s1021_s3] sm:$0xff]  ;;  %v323_v9 = vld [vmem:[%s1019_s1 + $0x150] sm:$0xff]  ;;  %v322_v10 = vld [vmem:[%s1019_s1 + $0x148] sm:$0xff] }
  0x25   : > { %404 = vmatpush1.msra.mxu0 %v289_v25  ;;  %484 = vmatpush1.msra.mxu1 %v353_v47  ;;  %v368_v11 = vld [vmem:[%s1021_s3 + $0xb8] sm:$0xff]  ;;  %v321_v12 = vld [vmem:[%s1019_s1 + $0x140] sm:$0xff]  ;;  %v367_v14 = vld [vmem:[%s1021_s3 + $0xb0] sm:$0xff] }
  0x26   : > { %405 = vmatprep.subr.mxu0 %v288_v27  ;;  %485 = vmatprep.subr.mxu1 %v648_v5  ;;  %v320_v13 = vld [vmem:[%s1019_s1 + $0x138] sm:$0xff]  ;;  %v319_v15 = vld [vmem:[%s1019_s1 + $0x130] sm:$0xff]  ;;  %v318_v16 = vld [vmem:[%s1019_s1 + $0x128] sm:$0xff] }
  0x27   : > { %406 = vmatpush1.msra.mxu0 %v287_v30  ;;  %486 = vmatpush1.msra.mxu1 %v352_v50  ;;  %v366_v17 = vld [vmem:[%s1021_s3 + $0xa8] sm:$0xff]  ;;  %v317_v18 = vld [vmem:[%s1019_s1 + $0x120] sm:$0xff]  ;;  %v316_v19 = vld [vmem:[%s1019_s1 + $0x118] sm:$0xff]  ;;  %v372_v30 = vshrl.u32 %v371_v29, 7 }
  0x28   : > { %407 = vmatprep.subr.mxu0 %v286_v31  ;;  %487 = vmatprep.subr.mxu1 %v648_v5  ;;  %v315_v20 = vld [vmem:[%s1019_s1 + $0x110] sm:$0xff]  ;;  %v314_v21 = vld [vmem:[%s1019_s1 + $0x108] sm:$0xff]  ;;  %v313_v22 = vld [vmem:[%s1019_s1 + $0x100] sm:$0xff] }
  0x29   : > { %408 = vmatpush1.msra.mxu0 %v285_v33  ;;  %488 = vmatpush1.msra.mxu1 %v351_v53  ;;  %v279_v23 = vld [vmem:[%s774_s29] sm:$0xff]  ;;  %v364_v25 = vld [vmem:[%s1021_s3 + $0x98] sm:$0xff]  ;;  %v363_v26 = vld [vmem:[%s1021_s3 + $0x90] sm:$0xff]  ;;  %v373_v31 = vsub.s32 0, %v372_v30  ;;  %v377_v33 = vsub.s32 1, %v372_v30 }
  0x2a   : > { %409 = vmatprep.subr.mxu0 %v284_v34  ;;  %489 = vmatprep.subr.mxu1 %v648_v5  ;;  %v365_v24 = vld [vmem:[%s1021_s3 + $0xa0] sm:$0xff]  ;;  %v362_v27 = vld [vmem:[%s1021_s3 + $0x88] sm:$0xff] }
  0x2b   : > { %410 = vmatpush1.msra.mxu0 %v283_v36  ;;  %490 = vmatpush1.msra.mxu1 %v350_v56  ;;  %v361_v28 = vld [vmem:[%s1021_s3 + $0x80] sm:$0xff] }
  0x2c   : > { %411 = vmatprep.subr.mxu0 %v282_v37  ;;  %491 = vmatprep.subr.mxu1 %v648_v5  ;;  %v369_v32 = vld [vmem:[%s1020_s2] sm:$0x3] }
  0x2d   : > { %412 = vmatpush1.msra.mxu0 %v281_v39  ;;  %492 = vmatpush1.msra.mxu1 %v349_v59  ;;  %v374_v34 = vrot.slane %v369_v32, %v373_v31  ;;  %v378_v35 = vrot.slane %v369_v32, %v377_v33 }
  0x2e   : > { %413 = vmatprep.subr.mxu0 %v344_v40  ;;  %493 = vmatprep.subr.mxu1 %v648_v5 }
  0x2f   : > { %414 = vmatpush2.msra.mxu0 %v343_v42  ;;  %494 = vmatpush1.msra.mxu1 %v348_v62 }
  0x30   : > { %415 = vmatprep.subr.mxu0 %v342_v43  ;;  %495 = vmatprep.subr.mxu1 %v648_v5  ;;  %v624_v43 = vld [vmem:[%s1022_s4] ss:$0 sm:$0xff] }
  0x31   : > { %416 = vmatpush2.msra.mxu0 %v341_v45  ;;  %496 = vmatpush1.msra.mxu1 %v347_v1 }
  0x32   : > { %417 = vmatprep.subr.mxu0 %v340_v46  ;;  %497 = vmatprep.subr.mxu1 %v648_v5 }
  0x33   : > { %418 = vmatpush2.msra.mxu0 %v339_v48  ;;  %498 = vmatpush1.msra.mxu1 %v346_v4  ;;  %v626_v48 = vld [vmem:[%s1023_s5] ss:$0 sm:$0xff] }
  0x34   : > { %419 = vmatprep.subr.mxu0 %v338_v49  ;;  %499 = vmatprep.subr.mxu1 %v648_v5 }
  0x35   : > { %420 = vmatpush2.msra.mxu0 %v337_v51  ;;  %500 = vmatpush1.msra.mxu1 %v345_v8 }
  0x36   : > { %421 = vmatprep.subr.mxu0 %v336_v52  ;;  %517 = vmatprep.subr.mxu1 %v648_v5  ;;  %v627_v52 = vld [vmem:[#allocation2] ss:$0 sm:$0xff] }
  0x37   : > { %422 = vmatpush2.msra.mxu0 %v335_v54  ;;  %518 = vmatpush2.msra.mxu1 %v368_v11 }
  0x38   : > { %423 = vmatprep.subr.mxu0 %v334_v55  ;;  %519 = vmatprep.subr.mxu1 %v648_v5 }
  0x39   : > { %424 = vmatpush2.msra.mxu0 %v333_v57  ;;  %520 = vmatpush2.msra.mxu1 %v367_v14 }
  0x3a   : > { %425 = vmatprep.subr.mxu0 %v332_v58  ;;  %521 = vmatprep.subr.mxu1 %v648_v5 }
  0x3b   : > { %426 = vmatpush2.msra.mxu0 %v331_v60  ;;  %522 = vmatpush2.msra.mxu1 %v366_v17 }
  0x3c   : > { %427 = vmatprep.subr.mxu0 %v330_v61  ;;  %523 = vmatprep.subr.mxu1 %v648_v5 }
  0x3d   : > { %428 = vmatpush2.msra.mxu0 %v329_v63  ;;  %524 = vmatpush2.msra.mxu1 %v365_v24 }
  0x3e   : > { %429 = vmatprep.subr.mxu0 %v328_v0  ;;  %525 = vmatprep.subr.mxu1 %v648_v5 }
  0x3f   : > { %430 = vmatpush2.msra.mxu0 %v327_v2  ;;  %526 = vmatpush2.msra.mxu1 %v364_v25 }
  0x40   : > { %431 = vmatprep.subr.mxu0 %v326_v3  ;;  %527 = vmatprep.subr.mxu1 %v648_v5 }
  0x41   : > { %432 = vmatpush2.msra.mxu0 %v325_v6  ;;  %528 = vmatpush2.msra.mxu1 %v363_v26 }
  0x42   : > { %433 = vmatprep.subr.mxu0 %v324_v7  ;;  %529 = vmatprep.subr.mxu1 %v648_v5 }
  0x43   : > { %434 = vmatpush2.msra.mxu0 %v323_v9  ;;  %530 = vmatpush2.msra.mxu1 %v362_v27 }
  0x44   : > { %435 = vmatprep.subr.mxu0 %v322_v10  ;;  %531 = vmatprep.subr.mxu1 %v648_v5 }
  0x45   : > { %436 = vmatpush2.msra.mxu0 %v321_v12  ;;  %532 = vmatpush2.msra.mxu1 %v361_v28 }
  0x46   : > { %437 = vmatprep.subr.mxu0 %v320_v13 }
  0x47   : > { %438 = vmatpush2.msra.mxu0 %v319_v15 }
  0x48   : > { %439 = vmatprep.subr.mxu0 %v318_v16 }
  0x49   : > { %440 = vmatpush2.msra.mxu0 %v317_v18 }
  0x4a   : > { %441 = vmatprep.subr.mxu0 %v316_v19 }
  0x4b   : > { %442 = vmatpush2.msra.mxu0 %v315_v20 }
  0x4c   : > { %443 = vmatprep.subr.mxu0 %v314_v21 }
  0x4d   : > { %444 = vmatpush2.msra.mxu0 %v313_v22 }
  0x4e   : > { %446 = vmatmul.mubr.f32.vlgmr.msra.gmra.mxu0 %v279_v23 }
 0x10e   : > { %v447_v36 = vpop.f32.mrf.mxu0 }
 0x10f   : > { %v448_v37 = vadd.f32 %v447_v36, %v374_v34 }
 0x110   : > { %v449_v38 = vpop.f32.mrf.mxu0 }
 0x111   : > { %v450_v39 = vadd.f32 %v449_v38, %v378_v35  ;;  %v454_v40 = vmul.f32 0.2, %v448_v37  ;;  %vm452_vm2 = vcmp.gt.f32.partialorder %v448_v37, 0.0 }
 0x113   : > { %vm453_vm0 = vcmp.gt.f32.partialorder %v450_v39, 0.0  ;;  %v455_v41 = vmul.f32 0.2, %v450_v39  ;;  %v456_v42 = vsel %vm452_vm2, %v448_v37, %v454_v40 }
 0x115   : > { %v457_v5 = vsel %vm453_vm0, %v450_v39, %v455_v41 }
 0x116   : > { %625 = vmatprep.mubr.msk.f32.mxu1 %vm465_vm1, %v457_v5 }
 0x117   : > { %534 = vmatmul.mubr.f32.vlgmr.msra.gmra.mxu1 %v456_v42 }
 0x1d7   : > { %v535_v44 = vpop.f32.mrf.mxu1 }
 0x1d8   : > { %v536_v45 = vadd.f32 %v624_v43, %v535_v44 }
 0x1d9   : > { %v537_v46 = vpop.f32.mrf.mxu1 }
 0x1da   : > { %v540_v47 = vmul.f32 0.2, %v536_v45  ;;  %vm539_vm3 = vcmp.gt.f32.partialorder %v536_v45, 0.0 }
 0x1dc   : > { %v541_v49 = vsel %vm539_vm3, %v536_v45, %v540_v47 }
 0x1dd   : > { %v549_v50 = vmul.f32 %v626_v48, %v541_v49 }
 0x1df   : > { %v550_v51 = vsel %vm465_vm1, %v549_v50, 0.0 }
 0x1e0   : > { %551 = vadd.xlane.f32.xlu0 %v550_v51 }
 0x269   : > { %v552_v53 = vpop.xlane.xlu0 %551 }
 0x26a   : > { %v560_v54 = vadd.f32 %v627_v52, %v552_v53 }
 0x26c   : > { %562 = vst.msk [vmem:[%s278_s22] sm:$0xff] %vm561_vm4, %v560_v54 }
 0x26d PF: > { %s19_s26 = sadd.s32 1, %s646_s26  }
 0x26e   : > { %p16_p4 = scmp.ge.s32.totalorder %s19_s26, 4  }
 0x270   :  { %18 = sbr.rel (!%p16_p4) target bundleno = 3 (0x3), region = 78 }

</bundles_post_ra>
